<compile_context>
chip_gen: v7x
topology: tpu7x:2x2x1
jax: 0.10.0
libtpu: 0.0.40
codegen_flags: <defaults>
</compile_context>

<pallas_src>
import jax
import jax.numpy as jnp
from jax.experimental import pallas as pl
from jax.experimental.pallas import tpu as pltpu

LANES = 128  # pad each of Q/K/V to one full vreg lane width


def _self_attention_kernel(x_ref, w_ref, b_ref, o_ref):
    # x_ref : (Bt*S, E) bf16      w_ref : (E, 3*LANES) bf16
    # b_ref : (1, 3*LANES) f32    o_ref : (Bt, S, LANES) f32
    bt, sq, lanes = o_ref.shape

    # Fused, lane-dense QKV projection (MXU, f32 accumulation). Wq/bq already
    # carry the 1/sqrt(key_dim) scale; padded columns are exactly zero.
    qkv = jnp.dot(x_ref[...], w_ref[...],
                  preferred_element_type=jnp.float32) + b_ref[...]
    qkv = qkv.reshape(bt, sq, 3 * lanes)                      # split leading rows

    q = qkv[..., :lanes].astype(jnp.bfloat16)                 # (Bt, S, 128)
    k = qkv[..., lanes:2 * lanes].astype(jnp.bfloat16)        # (Bt, S, 128)
    v = qkv[..., 2 * lanes:].astype(jnp.bfloat16)             # (Bt, S, 128)

    # scores[b, i, j] = q_bi . k_bj  (zero-padded lanes contribute nothing)
    s = jnp.einsum("bqd,bkd->bqk", q, k,
                   preferred_element_type=jnp.float32)        # (Bt, S_q, S_k)

    # softmax over the QUERY axis (torch F.softmax(..., dim=1)); f32 math.
    m = jnp.max(s, axis=1, keepdims=True)
    e = jnp.exp(s - m)
    denom = jnp.sum(e, axis=1, keepdims=True)
    attn = e * pl.reciprocal(denom, approx=True)              # EUP reciprocal

    out = jnp.einsum("bqk,bkd->bqd", attn.astype(jnp.bfloat16), v,
                     preferred_element_type=jnp.float32)      # (Bt, S, 128)
    o_ref[...] = out.astype(o_ref.dtype)                      # lane-dense store


def self_attention(x, wq, bq, wk, bk, wv, bv):
    """x: (B, S, E); wq/wk/wv: (Kd, E) PyTorch nn.Linear layout; bq/bk/bv: (Kd,)."""
    # TODO(synk): cross-attention path (memory is not None) not implemented; this
    # covers the forward's default memory=None self-attention branch.
    B, S, E = x.shape
    Kd = wq.shape[0]
    assert Kd <= LANES
    scale = 1.0 / (float(Kd) ** 0.5)

    # --- parameter-side folds (done once, before the bf16 cast) ---------------
    def _pad_cols(w):  # (Kd, E) -> (E, LANES) with zero lane padding
        return jnp.pad(w.T, ((0, 0), (0, LANES - Kd)))

    w_qkv = jnp.concatenate(
        [_pad_cols(wq * scale), _pad_cols(wk), _pad_cols(wv)], axis=1
    ).astype(jnp.bfloat16)                                     # (E, 3*LANES)
    b_qkv = jnp.concatenate(
        [jnp.pad(bq * scale, (0, LANES - Kd)),
         jnp.pad(bk, (0, LANES - Kd)),
         jnp.pad(bv, (0, LANES - Kd))]
    ).reshape(1, 3 * LANES).astype(jnp.float32)                # (1, 3*LANES)

    # --- batch blocking --------------------------------------------------------
    # Bt*S ~ 256 rows fills the MXU M dimension and amortizes per-step overhead.
    Bt = max(1, min(B, max(1, 256 // max(S, 1))))
    # v7x has 2 TensorCores: prefer >=2 grid steps when each half still fills MXU.
    if pl.cdiv(B, Bt) < 2 and B > 1 and pl.cdiv(B, 2) * S >= 128:
        Bt = pl.cdiv(B, 2)
    # keep the (Bt*S, E) row block sublane-aligned when the grid tiles the batch.
    while Bt < B and (Bt * S) % 8 != 0:
        Bt += 1
    Bp = pl.cdiv(B, Bt) * Bt
    grid_n = Bp // Bt

    x_in = x.astype(jnp.bfloat16)
    if Bp != B:
        x_in = jnp.pad(x_in, ((0, Bp - B), (0, 0), (0, 0)))    # zero batches: harmless
    x_rows = x_in.reshape(Bp * S, E)                            # lane-dense row slab

    cost = pl.CostEstimate(
        flops=2 * Bp * S * E * (3 * LANES) + 2 * Bp * S * S * LANES * 2,
        transcendentals=Bp * S * S,
        bytes_accessed=(x_rows.size * 2 + w_qkv.size * 2
                        + b_qkv.size * 4 + Bp * S * LANES * 4),
    )

    out_padded = pl.pallas_call(
        _self_attention_kernel,
        out_shape=jax.ShapeDtypeStruct((Bp, S, LANES), jnp.float32),
        grid_spec=pltpu.PrefetchScalarGridSpec(
            num_scalar_prefetch=0,
            grid=(grid_n,),
            in_specs=[
                pl.BlockSpec((Bt * S, E), lambda b: (b, 0)),
                pl.BlockSpec((E, 3 * LANES), lambda b: (0, 0)),   # resident weight
                pl.BlockSpec((1, 3 * LANES), lambda b: (0, 0)),   # resident bias
            ],
            out_specs=pl.BlockSpec((Bt, S, LANES), lambda b: (b, 0, 0)),
        ),
        compiler_params=pltpu.CompilerParams(
            dimension_semantics=("parallel",),
        ),
        cost_estimate=cost,
    )(x_rows, w_qkv, b_qkv)

    # drop padded batches and padded lanes in the wrapper (lane-dense store wins).
    return out_padded[:B, :, :Kd].astype(x.dtype)


def _reference(x, wq, bq, wk, bk, wv, bv):
    """Pure-JAX f32 mirror of the PyTorch forward (memory=None)."""
    Kd = wq.shape[0]
    q = jnp.einsum("bse,ke->bsk", x, wq) + bq
    k = jnp.einsum("bse,ke->bsk", x, wk) + bk
    v = jnp.einsum("bse,ke->bsk", x, wv) + bv
    s = jnp.einsum("bqd,bkd->bqk", q, k) / (float(Kd) ** 0.5)
    a = jax.nn.softmax(s, axis=1)        # torch dim=1: normalize over the query axis
    return jnp.einsum("bqk,bkd->bqd", a, v)


if __name__ == "__main__":
    # Module defaults: emb_dim=256, key_dim=64; small batch=2, seq=8.
    B, S, E, Kd = 2, 8, 256, 64

    key = jax.random.PRNGKey(0)
    kx, kwq, kbq, kwk, kbk, kwv, kbv = jax.random.split(key, 7)

    x = jax.random.normal(kx, (B, S, E), dtype=jnp.float32)
    # Deterministic synthetic parameters (PyTorch Linear layout: (out, in)).
    wq = jax.random.normal(kwq, (Kd, E), dtype=jnp.float32) * 0.05
    bq = jax.random.normal(kbq, (Kd,), dtype=jnp.float32) * 0.05
    wk = jax.random.normal(kwk, (Kd, E), dtype=jnp.float32) * 0.05
    bk = jax.random.normal(kbk, (Kd,), dtype=jnp.float32) * 0.05
    wv = jax.random.normal(kwv, (Kd, E), dtype=jnp.float32) * 0.05
    bv = jax.random.normal(kbv, (Kd,), dtype=jnp.float32) * 0.05

    out = self_attention(x, wq, bq, wk, bk, wv, bv)
    out = jax.block_until_ready(out)

    ref = _reference(x, wq, bq, wk, bk, wv, bv)
    assert out.shape == (B, S, Kd)
    # Tolerance loosened for bf16 matmul operands (f32 accumulation / softmax).
    assert jnp.allclose(out, ref, atol=3e-2, rtol=3e-2)

    print("KERNEL_OK")
</pallas_src>

<mosaic_0001>
module attributes {stable_mosaic.version = 11 : i64} {
  func.func @_self_attention_kernel(%arg0: i32, %arg1: memref<16x256xbf16, #tpu.memory_space<vmem>>, %arg2: memref<256x384xbf16, #tpu.memory_space<vmem>>, %arg3: memref<1x384xf32, #tpu.memory_space<vmem>>, %arg4: memref<2x8x128xf32, #tpu.memory_space<vmem>>) attributes {dimension_semantics = [#tpu.dimension_semantics<parallel>], iteration_bounds = array<i64: 1>, scalar_prefetch = 0 : i64, scratch_operands = 0 : i64, tpu.core_type = #tpu.core_type<tc>, window_params = [{transform_indices = @transform_0, window_bounds = array<i64: 16, 256>}, {pipeline_mode = #tpu.pipeline_mode<synchronous>, transform_indices = @transform_1, window_bounds = array<i64: 256, 384>}, {pipeline_mode = #tpu.pipeline_mode<synchronous>, transform_indices = @transform_2, window_bounds = array<i64: 1, 384>}, {transform_indices = @transform_3, window_bounds = array<i64: 2, 8, 128>}]} {
    %c0 = arith.constant 0 : index
    %c0_0 = arith.constant 0 : index
    %0 = vector.load %arg1[%c0, %c0_0] : memref<16x256xbf16, #tpu.memory_space<vmem>>, vector<16x256xbf16>
    %c0_1 = arith.constant 0 : index
    %c0_2 = arith.constant 0 : index
    %1 = vector.load %arg2[%c0_1, %c0_2] : memref<256x384xbf16, #tpu.memory_space<vmem>>, vector<256x384xbf16>
    %cst = arith.constant dense<0.000000e+00> : vector<16x384xf32>
    %2 = tpu.matmul %0, %1, %cst {dimension_numbers = #tpu.dot_dimension_numbers<[1], [0], [0], [1], [0, 0, 1, 1], [], []>} : vector<16x256xbf16>, vector<256x384xbf16>, vector<16x384xf32> -> vector<16x384xf32>
    %c0_3 = arith.constant 0 : index
    %c0_4 = arith.constant 0 : index
    %3 = vector.load %arg3[%c0_3, %c0_4] : memref<1x384xf32, #tpu.memory_space<vmem>>, vector<1x384xf32>
    %4 = vector.broadcast %3 : vector<1x384xf32> to vector<16x384xf32>
    %5 = arith.addf %2, %4 : vector<16x384xf32>
    %6 = vector.shape_cast %5 : vector<16x384xf32> to vector<2x8x384xf32>
    %7 = vector.extract_strided_slice %6 {offsets = [0, 0, 0], sizes = [2, 8, 128], strides = [1, 1, 1]} : vector<2x8x384xf32> to vector<2x8x128xf32>
    %8 = arith.truncf %7 : vector<2x8x128xf32> to vector<2x8x128xbf16>
    %9 = vector.extract_strided_slice %6 {offsets = [0, 0, 128], sizes = [2, 8, 128], strides = [1, 1, 1]} : vector<2x8x384xf32> to vector<2x8x128xf32>
    %10 = arith.truncf %9 : vector<2x8x128xf32> to vector<2x8x128xbf16>
    %11 = vector.extract_strided_slice %6 {offsets = [0, 0, 256], sizes = [2, 8, 128], strides = [1, 1, 1]} : vector<2x8x384xf32> to vector<2x8x128xf32>
    %12 = arith.truncf %11 : vector<2x8x128xf32> to vector<2x8x128xbf16>
    "tpu.trace_start"() <{level = 10 : i32, message = "bqd,bkd->bqk"}> : () -> ()
    %cst_5 = arith.constant dense<0.000000e+00> : vector<2x8x8xf32>
    %13 = tpu.matmul %8, %10, %cst_5 {dimension_numbers = #tpu.dot_dimension_numbers<[2], [2], [1], [1], [0, 0, 0, 1, 1, 1], [0], [0]>} : vector<2x8x128xbf16>, vector<2x8x128xbf16>, vector<2x8x8xf32> -> vector<2x8x8xf32>
    "tpu.trace_stop"() : () -> ()
    %cst_6 = arith.constant dense<0xFF800000> : vector<2x8xf32>
    %14 = vector.multi_reduction <maximumf>, %13, %cst_6 [1] : vector<2x8x8xf32> to vector<2x8xf32>
    %15 = vector.shape_cast %14 : vector<2x8xf32> to vector<2x1x8xf32>
    %16 = vector.broadcast %15 : vector<2x1x8xf32> to vector<2x8x8xf32>
    %17 = arith.subf %13, %16 : vector<2x8x8xf32>
    %18 = math.exp %17 : vector<2x8x8xf32>
    %cst_7 = arith.constant dense<0.000000e+00> : vector<2x8xf32>
    %19 = vector.multi_reduction <add>, %18, %cst_7 [1] : vector<2x8x8xf32> to vector<2x8xf32>
    %20 = vector.shape_cast %19 : vector<2x8xf32> to vector<2x1x8xf32>
    %21 = tpu.reciprocal %20 {approx = true} : vector<2x1x8xf32> -> vector<2x1x8xf32>
    %22 = vector.broadcast %21 : vector<2x1x8xf32> to vector<2x8x8xf32>
    %23 = arith.mulf %18, %22 : vector<2x8x8xf32>
    %24 = arith.truncf %23 : vector<2x8x8xf32> to vector<2x8x8xbf16>
    "tpu.trace_start"() <{level = 10 : i32, message = "bqk,bkd->bqd"}> : () -> ()
    %cst_8 = arith.constant dense<0.000000e+00> : vector<2x8x128xf32>
    %25 = tpu.matmul %24, %12, %cst_8 {dimension_numbers = #tpu.dot_dimension_numbers<[2], [1], [1], [2], [0, 0, 0, 1, 1, 2], [0], [0]>} : vector<2x8x8xbf16>, vector<2x8x128xbf16>, vector<2x8x128xf32> -> vector<2x8x128xf32>
    "tpu.trace_stop"() : () -> ()
    %c0_9 = arith.constant 0 : index
    %c0_10 = arith.constant 0 : index
    %c0_11 = arith.constant 0 : index
    %26 = vector.load %arg4[%c0_9, %c0_10, %c0_11] : memref<2x8x128xf32, #tpu.memory_space<vmem>>, vector<2x8x128xf32>
    tpu.vector_store %arg4[%c0_9, %c0_10, %c0_11], %25 {strides = array<i32>} : memref<2x8x128xf32, #tpu.memory_space<vmem>>, vector<2x8x128xf32>,
    return
  }
  func.func @transform_0(%arg0: i32) -> (i32, i32) {
    %c0_i32 = arith.constant 0 : i32
    %c0_i32_0 = arith.constant 0 : i32
    return %arg0, %c0_i32 : i32, i32
  }
  func.func @transform_1(%arg0: i32) -> (i32, i32) {
    %c0_i32 = arith.constant 0 : i32
    %c0_i32_0 = arith.constant 0 : i32
    %c0_i32_1 = arith.constant 0 : i32
    return %c0_i32, %c0_i32_0 : i32, i32
  }
  func.func @transform_2(%arg0: i32) -> (i32, i32) {
    %c0_i32 = arith.constant 0 : i32
    %c0_i32_0 = arith.constant 0 : i32
    %c0_i32_1 = arith.constant 0 : i32
    return %c0_i32, %c0_i32_0 : i32, i32
  }
  func.func @transform_3(%arg0: i32) -> (i32, i32, i32) {
    %c0_i32 = arith.constant 0 : i32
    %c0_i32_0 = arith.constant 0 : i32
    %c0_i32_1 = arith.constant 0 : i32
    return %arg0, %c0_i32, %c0_i32_0 : i32, i32, i32
  }
}

</mosaic_0001>

<bundles_post_ra>
// kernel: tpu_custom_call.1
= control target key start
LH: loop header
LB: loop body
LE: loop exit
PB: predicated region body
PF: predicated region fallthrough
CT: control target
= control target key end

     0   :  { %8 = vsyncpa [#allocation3], 0  ;;  %s1071_s0 = inlined_call_operand.hbm [shape: bf16[16,256], index: 0, kind: input, shape index: {}]   ;;  %s1072_s1 = inlined_call_operand.hbm [shape: bf16[256,384], index: 1, kind: input, shape index: {}]   ;;  %s1073_s2 = inlined_call_operand.vmem [shape: f32[1,384], index: 2, kind: input, shape index: {}]   ;;  %s1074_s3 = inlined_call_operand.hbm [shape: f32[2,8,128], index: 3, kind: output, shape index: {}]  }
   0x1   :  { %9 = vsyncpa [#allocation6], 0 }
   0x2   :  { %10 = vsyncpa [#allocation4], 0  ;;  %s979_s12 = smov [#allocation2]   ;;  %s907_s16 = scalar_lea.hbm %s1071_s0, 256 }
   0x3   :  { %s16_s13 = sshll.u32 %s979_s12, 4  ;;  %p908_p0 = scmp.ne.s32.totalorder %s1071_s0, %s907_s16  ;;  %s17_s13 = int_to_ptr.vmem [resolvable:$true] %s16_s13 }
   0x4   :  { %p911_p1 = scmp.lt.u32.totalorder %s907_s16, %s1071_s0 }
   0x6   :  { %p913_p2 = pnand %p911_p1, %p908_p0 }
   0x8   :  { %916 = shalt.err (!%p913_p2)
}
   0x9   :  { %s917_s21 = scalar_lea.vmem %s17_s13, 256  ;;  %p922_p4 = scmp.lt.s32.totalorder %s17_s13, %s17_s13 }
   0xa   :  { %p918_p3 = scmp.ne.s32.totalorder %s17_s13, %s917_s21  ;;  %p923_p5 = scmp.lt.s32.totalorder %s917_s21, %s917_s21 }
   0xc   :  { %p924_p6 = por %p923_p5, %p922_p4 }
   0xe   :  { %p925_p7 = pnand %p924_p6, %p918_p3 }
  0x10   :  { %928 = shalt.err (!%p925_p7)
}
  0x11   :  { %s980_s22 = smov 128   ;;  %s981_s23 = smov 8  }
  0x12   :  { %22 = dma.hbm_to_vmem [thread:$0]  %s1071_s0, 256, %s17_s13, [#allocation3], %s980_s22, %s980_s22, %s981_s23  }
  0x13   :  { %s982_s26 = smov [#allocation5]   ;;  %s929_s30 = scalar_lea.hbm %s1072_s1, 6144 }
  0x14   :  { %s28_s27 = sshll.u32 %s982_s26, 4  ;;  %p930_p8 = scmp.ne.s32.totalorder %s1072_s1, %s929_s30  ;;  %s29_s27 = int_to_ptr.vmem [resolvable:$true] %s28_s27 }
  0x15   :  { %p933_p9 = scmp.lt.u32.totalorder %s929_s30, %s1072_s1 }
  0x17   :  { %p935_p10 = pnand %p933_p9, %p930_p8 }
  0x19   :  { %938 = shalt.err (!%p935_p10)
}
  0x1a   :  { %s939_s8 = scalar_lea.vmem %s29_s27, 6144  ;;  %p944_p12 = scmp.lt.s32.totalorder %s29_s27, %s29_s27 }
  0x1b   :  { %p940_p11 = scmp.ne.s32.totalorder %s29_s27, %s939_s8  ;;  %p945_p13 = scmp.lt.s32.totalorder %s939_s8, %s939_s8 }
  0x1d   :  { %p946_p0 = por %p945_p13, %p944_p12 }
  0x1f   :  { %p947_p1 = pnand %p946_p0, %p940_p11 }
  0x21   :  { %950 = shalt.err (!%p947_p1)
}
  0x22   :  { %s983_s0 = smov 192   ;;  %s984_s9 = smov 12  }
  0x23   :  { %34 = dma.hbm_to_vmem [thread:$0]  %s1072_s1, 6144, %s29_s27, [#allocation6], %s983_s0, %s983_s0, %s984_s9  }
  0x24   :  { %973 = dma.done.wait [#allocation3], 256  }
  0x25   :  { %974 = vsyncadd [#allocation3], 4294967040 }
  0x26   :  { %975 = dma.done.wait [#allocation6], 6144  }
  0x27   :  { %976 = vsyncadd [#allocation6], 4294961152  ;;  %v832_v0 = vld [vmem:[#allocation5 + $0x4] ss:$12 sps:$4 sm:$0xff]   ;;  %v834_v1 = vld [vmem:[#allocation5] ss:$12 sps:$4 sm:$0xff]   ;;  %v112_v51 = vlaneseq }
  0x28   :  { %393 = vmatprep.subr.bf16.mxu0 %v832_v0  ;;  %v835_v2 = vld [vmem:[#allocation5 + $0x1c] ss:$12 sps:$4 sm:$0xff]   ;;  %v837_v3 = vld [vmem:[#allocation5 + $0x18] ss:$12 sps:$4 sm:$0xff]   ;;  %v838_v4 = vld [vmem:[#allocation5 + $0x34] ss:$12 sps:$4 sm:$0xff]  }
  0x29   :  { %394 = vmatpush1.bf16.msra.mxu0 %v834_v1  ;;  %v840_v5 = vld [vmem:[#allocation5 + $0x30] ss:$12 sps:$4 sm:$0xff]   ;;  %v841_v6 = vld [vmem:[#allocation5 + $0x4c] ss:$12 sps:$4 sm:$0xff]   ;;  %v843_v7 = vld [vmem:[#allocation5 + $0x48] ss:$12 sps:$4 sm:$0xff]  }
  0x2a   :  { %395 = vmatprep.subr.bf16.mxu0 %v835_v2  ;;  %v844_v8 = vld [vmem:[#allocation5 + $0x64] ss:$12 sps:$4 sm:$0xff]   ;;  %v846_v9 = vld [vmem:[#allocation5 + $0x60] ss:$12 sps:$4 sm:$0xff]   ;;  %v847_v10 = vld [vmem:[#allocation5 + $0x7c] ss:$12 sps:$4 sm:$0xff]  }
  0x2b   :  { %v849_v11 = vld [vmem:[#allocation5 + $0x78] ss:$12 sps:$4 sm:$0xff]   ;;  %v850_v12 = vld [vmem:[#allocation5 + $0x94] ss:$12 sps:$4 sm:$0xff]   ;;  %v852_v13 = vld [vmem:[#allocation5 + $0x90] ss:$12 sps:$4 sm:$0xff]  }
  0x2c   :  { %v853_v14 = vld [vmem:[#allocation5 + $0xac] ss:$12 sps:$4 sm:$0xff]   ;;  %v882_v15 = vld [vmem:[#allocation2 + $0x4] ss:$8 sps:$4 sm:$0xff]   ;;  %v856_v22 = vld [vmem:[#allocation5 + $0xc4] ss:$12 sps:$4 sm:$0xff]  }
  0x2d   :  { %396 = vmatpush1.bf16.msra.mxu0 %v837_v3  ;;  %v883_v16 = vld [vmem:[#allocation5 + $0xc8] ss:$12 sps:$4 sm:$0xff]   ;;  %425 = vmatprep.mubr.bf16.mxu0 %v882_v15  ;;  %v885_v19 = vld [vmem:[#allocation5 + $0xe0] ss:$12 sps:$4 sm:$0xff]   ;;  %v887_v21 = vld [vmem:[#allocation5 + $0xf8] ss:$12 sps:$4 sm:$0xff]  }
  0x2e   :  { %397 = vmatprep.subr.bf16.mxu0 %v838_v4  ;;  %v884_v17 = vld [vmem:[#allocation5 + $0x8] ss:$12 sps:$4 sm:$0xff]   ;;  %769 = vmatprep.subr.bf16.mxu1 %v883_v16  ;;  %v886_v20 = vld [vmem:[#allocation5 + $0x20] ss:$12 sps:$4 sm:$0xff]   ;;  %v888_v24 = vld [vmem:[#allocation5 + $0x38] ss:$12 sps:$4 sm:$0xff]  }
  0x2f   :  { %v855_v18 = vld [vmem:[#allocation5 + $0xa8] ss:$12 sps:$4 sm:$0xff]   ;;  %468 = vmatprep.mubr.bf16.mxu1 %v882_v15  ;;  %770 = vmatpush3.bf16.msra.mxu1 %v884_v17  ;;  %v858_v23 = vld [vmem:[#allocation5 + $0xc0] ss:$12 sps:$4 sm:$0xff]   ;;  %v889_v25 = vld [vmem:[#allocation5 + $0x110] ss:$12 sps:$4 sm:$0xff]  }
  0x30   :  { %771 = vmatprep.subr.bf16.mxu1 %v885_v19  ;;  %v859_v26 = vld [vmem:[#allocation5 + $0xdc] ss:$12 sps:$4 sm:$0xff]   ;;  %v861_v27 = vld [vmem:[#allocation5 + $0xd8] ss:$12 sps:$4 sm:$0xff]   ;;  %v862_v30 = vld [vmem:[#allocation5 + $0xf4] ss:$12 sps:$4 sm:$0xff]  }
  0x31   :  { %398 = vmatpush1.bf16.msra.mxu0 %v840_v5  ;;  %v890_v28 = vld [vmem:[#allocation5 + $0x50] ss:$12 sps:$4 sm:$0xff]   ;;  %v891_v29 = vld [vmem:[#allocation5 + $0x128] ss:$12 sps:$4 sm:$0xff]   ;;  %v893_v33 = vld [vmem:[#allocation5 + $0x140] ss:$12 sps:$4 sm:$0xff]  }
  0x32   :  { %399 = vmatprep.subr.bf16.mxu0 %v841_v6  ;;  %v892_v31 = vld [vmem:[#allocation5 + $0x68] ss:$12 sps:$4 sm:$0xff]   ;;  %v864_v32 = vld [vmem:[#allocation5 + $0xf0] ss:$12 sps:$4 sm:$0xff]   ;;  %v865_v34 = vld [vmem:[#allocation5 + $0x10c] ss:$12 sps:$4 sm:$0xff]  }
  0x33   :  { %772 = vmatpush3.bf16.msra.mxu1 %v886_v20  ;;  %v894_v35 = vld [vmem:[#allocation5 + $0x80] ss:$12 sps:$4 sm:$0xff]   ;;  %v867_v36 = vld [vmem:[#allocation5 + $0x108] ss:$12 sps:$4 sm:$0xff]   ;;  %v895_v37 = vld [vmem:[#allocation5 + $0x158] ss:$12 sps:$4 sm:$0xff]  }
  0x34   :  { %773 = vmatprep.subr.bf16.mxu1 %v887_v21  ;;  %v868_v38 = vld [vmem:[#allocation5 + $0x124] ss:$12 sps:$4 sm:$0xff]   ;;  %v870_v40 = vld [vmem:[#allocation5 + $0x120] ss:$12 sps:$4 sm:$0xff]   ;;  %v871_v42 = vld [vmem:[#allocation5 + $0x13c] ss:$12 sps:$4 sm:$0xff]  }
  0x35   :  { %400 = vmatpush1.bf16.msra.mxu0 %v843_v7  ;;  %v896_v39 = vld [vmem:[#allocation5 + $0x98] ss:$12 sps:$4 sm:$0xff]   ;;  %v897_v41 = vld [vmem:[#allocation5 + $0x170] ss:$12 sps:$4 sm:$0xff]   ;;  %v874_v45 = vld [vmem:[#allocation5 + $0x154] ss:$12 sps:$4 sm:$0xff]  }
  0x36   :  { %401 = vmatprep.subr.bf16.mxu0 %v844_v8  ;;  %v898_v43 = vld [vmem:[#allocation5 + $0xb0] ss:$12 sps:$4 sm:$0xff]   ;;  %v873_v44 = vld [vmem:[#allocation5 + $0x138] ss:$12 sps:$4 sm:$0xff]   ;;  %v879_v49 = vld [vmem:[#allocation5 + $0x168] ss:$12 sps:$4 sm:$0xff]  }
  0x37   :  { %774 = vmatpush3.bf16.msra.mxu1 %v888_v24  ;;  %v876_v46 = vld [vmem:[#allocation5 + $0x150] ss:$12 sps:$4 sm:$0xff]   ;;  %v877_v48 = vld [vmem:[#allocation5 + $0x16c] ss:$12 sps:$4 sm:$0xff]   ;;  %v985_v50 = vmov 0.0   ;;  %vm986_vm0 = vmmov 0  }
  0x38   :  { %775 = vmatprep.subr.bf16.mxu1 %v889_v25  ;;  %v880_v47 = vld [vmem:[#allocation2] ss:$8 sps:$4 sm:$0xff]   ;;  %v113_v52 = vshrl.u32 %v112_v51, 7  ;;  %vm607_vm1 = vcmask 1043456   ;;  %vm563_vm2 = vcmask 64512  }
  0x39   :  { %402 = vmatpush1.bf16.msra.mxu0 %v846_v9  ;;  %v110_v55 = vld [vmem:[%s1073_s2] sm:$0x7]  ;;  %s987_s2 = smov [#allocation7]  }
  0x3a   :  { %403 = vmatprep.subr.bf16.mxu0 %v847_v10  ;;  %v122_v53 = vsub.s32 2, %v113_v52  ;;  %v118_v60 = vsub.s32 1, %v113_v52  ;;  %v114_v1 = vsub.s32 0, %v113_v52  ;;  %s704_s13 = sshll.u32 %s987_s2, 4  ;;  %s705_s13 = int_to_ptr.vmem [resolvable:$true] %s704_s13 }
  0x3b   :  { %776 = vmatpush3.bf16.msra.mxu1 %v890_v28  ;;  %s951_s14 = scalar_lea.vmem %s705_s13, 256  ;;  %p956_p3 = scmp.lt.s32.totalorder %s705_s13, %s705_s13 }
  0x3c   :  { %777 = vmatprep.subr.bf16.mxu1 %v891_v29  ;;  %v123_v57 = vrot.slane %v110_v55, %v122_v53  ;;  %v119_v0 = vrot.slane %v110_v55, %v118_v60  ;;  %v115_v6 = vrot.slane %v110_v55, %v114_v1  ;;  %p952_p2 = scmp.ne.s32.totalorder %s705_s13, %s951_s14  ;;  %p957_p4 = scmp.lt.s32.totalorder %s951_s14, %s951_s14 }
  0x3d   :  { %404 = vmatpush1.bf16.msra.mxu0 %v849_v11 }
  0x3e   :  { %405 = vmatprep.subr.bf16.mxu0 %v850_v12  ;;  %p958_p5 = por %p957_p4, %p956_p3 }
  0x3f   :  { %778 = vmatpush3.bf16.msra.mxu1 %v892_v31 }
  0x40   :  { %779 = vmatprep.subr.bf16.mxu1 %v893_v33  ;;  %p959_p6 = pnand %p958_p5, %p952_p2 }
  0x41   :  { %406 = vmatpush1.bf16.msra.mxu0 %v852_v13 }
  0x42   :  { %407 = vmatprep.subr.bf16.mxu0 %v853_v14 }
  0x43   :  { %780 = vmatpush3.bf16.msra.mxu1 %v894_v35 }
  0x44   :  { %781 = vmatprep.subr.bf16.mxu1 %v895_v37 }
  0x45   :  { %408 = vmatpush1.bf16.msra.mxu0 %v855_v18 }
  0x46   :  { %409 = vmatprep.subr.bf16.mxu0 %v856_v22 }
  0x47   :  { %782 = vmatpush3.bf16.msra.mxu1 %v896_v39 }
  0x48   :  { %783 = vmatprep.subr.bf16.mxu1 %v897_v41 }
  0x49   :  { %410 = vmatpush1.bf16.msra.mxu0 %v858_v23 }
  0x4a   :  { %411 = vmatprep.subr.bf16.mxu0 %v859_v26 }
  0x4b   :  { %784 = vmatpush3.bf16.msra.mxu1 %v898_v43 }
  0x4c   :  { %799 = vmatprep.subr.bf16.mxu1 %v985_v50 }
  0x4d   :  { %412 = vmatpush1.bf16.msra.mxu0 %v861_v27 }
  0x4e   :  { %413 = vmatprep.subr.bf16.mxu0 %v862_v30  ;;  %469 = vmatmul.mubr.bf16.vlgmr.msra.gmra.mrb[0].mxu1 %v880_v47 }
  0x4f   :  { %801 = vmatprep.mubr.msk.bf16.mxu1 %vm986_vm0, %v985_v50 }
  0x51   :  { %414 = vmatpush1.bf16.msra.mxu0 %v864_v32 }
  0x52   :  { %415 = vmatprep.subr.bf16.mxu0 %v865_v34 }
  0x55   :  { %416 = vmatpush1.bf16.msra.mxu0 %v867_v36 }
  0x56   :  { %417 = vmatprep.subr.bf16.mxu0 %v868_v38 }
  0x59   :  { %418 = vmatpush1.bf16.msra.mxu0 %v870_v40 }
  0x5a   :  { %419 = vmatprep.subr.bf16.mxu0 %v871_v42 }
  0x5d   :  { %420 = vmatpush1.bf16.msra.mxu0 %v873_v44 }
  0x5e   :  { %421 = vmatprep.subr.bf16.mxu0 %v874_v45 }
  0x61   :  { %422 = vmatpush1.bf16.msra.mxu0 %v876_v46 }
  0x62   :  { %423 = vmatprep.subr.bf16.mxu0 %v877_v48 }
  0x65   :  { %424 = vmatpush1.bf16.msra.mxu0 %v879_v49 }
  0x68   :  { %426 = vmatmul.mubr.bf16.vlgmr.msra.gmra.mrb[0].mxu0 %v880_v47 }
 0x121   :  { %v785_v54 = vpop.f32.mrb[0].mxu1 }
 0x122   :  { %v786_v56 = vpop.f32.mrb[1].mxu1 }
 0x123   :  { %v787_v58 = vadd.f32 %v786_v56, %v785_v54  ;;  %v788_v59 = vpop.f32.mrb[2].mxu1 }
 0x124   :  { %v789_v61 = vpop.f32.mrb[3].mxu1 }
 0x125   :  { %v790_v62 = vadd.f32 %v789_v61, %v788_v59  ;;  %v471_v15 = vadd.f32 %v787_v58, %v123_v57 }
 0x127   :  { %v474_v63 = vadd.f32 %v790_v62, %v123_v57  ;;  %v481_v16 = vpack.c.bf16 %v471_v15, %v471_v15 }
 0x129   :  { %v482_v17 = vpack.c.bf16 %v474_v63, %v474_v63  ;;  %v609_v18 = vsel %vm607_vm1, %v481_v16, 0 }
 0x12b   :  { %v655_v19 = vsel %vm607_vm1, %v482_v17, 0 }
 0x13b   :  { %v427_v2 = vpop.f32.mrb[0].mxu0 }
 0x13c   :  { %v429_v3 = vpop.f32.mrb[1].mxu0  ;;  %v428_v9 = vadd.f32 %v427_v2, %v115_v6 }
 0x13d   :  { %v430_v4 = vadd.f32 %v429_v3, %v119_v0  ;;  %v431_v5 = vpop.f32.mrb[2].mxu0 }
 0x13e   :  { %v433_v7 = vpop.f32.mrb[3].mxu0  ;;  %v477_v11 = vpack.c.bf16 %v428_v9, %v428_v9  ;;  %v432_v13 = vadd.f32 %v431_v5, %v115_v6 }
 0x13f   :  { %v479_v8 = vpack.c.bf16 %v430_v4, %v430_v4  ;;  %v434_v10 = vadd.f32 %v433_v7, %v119_v0 }
 0x140   :  { %v478_v14 = vpack.c.bf16 %v432_v13, %v432_v13 }
 0x141   :  { %800 = vmatpush3.bf16.xpose.msra.mxu1 %v479_v8  ;;  %v480_v12 = vpack.c.bf16 %v434_v10, %v434_v10 }
 0x142   :  { %805 = vmatprep.subr.bf16.mxu1 %v985_v50 }
 0x148   :  { %802 = vmatmul.mubr.bf16.vlgmr.msra.gmra.mrb[4].mxu1 %v477_v11 }
 0x149   :  { %806 = vmatpush3.bf16.xpose.msra.mxu1 %v480_v12  ;;  %807 = vmatprep.mubr.msk.bf16.mxu1 %vm986_vm0, %v985_v50 }
 0x14a   :  { %811 = vmatprep.subr.bf16.mxu1 %v985_v50 }
 0x150   :  { %808 = vmatmul.mubr.bf16.vlgmr.msra.gmra.mrb[8].mxu1 %v478_v14 }
 0x151   :  { %813 = vmatprep.mubr.msk.bf16.mxu1 %vm986_vm0, %v985_v50  ;;  %812 = vmatpush3.bf16.msra.mxu1 %v609_v18 }
 0x152   :  { %817 = vmatprep.subr.bf16.mxu1 %v985_v50 }
 0x21b   :  { %v517_v20 = vpop.f32.mrb[4].mxu1 }
 0x21c   :  { %v564_v21 = vsel %vm563_vm2, %v517_v20, -inf  ;;  %v803_v22 = vpop.f32.mrb[5].mxu1 }
 0x21d   :  { %v565_v23 = vrot.slane %v564_v21, 4  ;;  %v520_v24 = vpop.f32.mrb[6].mxu1 }
 0x21e   :  { %v804_v25 = vpop.f32.mrb[7].mxu1 }
 0x21f   :  { %v566_v26 = vmax.f32 %v564_v21, %v565_v23 }
 0x221   :  { %v567_v27 = vrot.slane %v566_v26, 2 }
 0x223   :  { %v568_v28 = vmax.f32 %v566_v26, %v567_v27  ;;  %v557_v29 = vpop.f32.mrb[8].mxu1 }
 0x224   :  { %v571_v30 = vsel %vm563_vm2, %v557_v29, -inf  ;;  %v809_v31 = vpop.f32.mrb[9].mxu1 }
 0x225   :  { %v569_v32 = vrot.slane %v568_v28, 1  ;;  %v572_v33 = vrot.slane %v571_v30, 4  ;;  %v560_v34 = vpop.f32.mrb[10].mxu1 }
 0x226   :  { %v810_v35 = vpop.f32.mrb[11].mxu1 }
 0x227   :  { %v570_v36 = vmax.f32 %v568_v28, %v569_v32  ;;  %v573_v37 = vmax.f32 %v571_v30, %v572_v33 }
 0x229   :  { %v578_v38 = vsub.f32 %v517_v20, %v570_v36  ;;  %v574_v39 = vrot.slane %v573_v37, 2 }
 0x22b   :  { %v580_v40 = vmul.f32 1.442695, %v578_v38  ;;  %v575_v41 = vmax.f32 %v573_v37, %v574_v39 }
 0x22d   :  { %899 = vpow2.f32 %v580_v40  ;;  %v576_v42 = vrot.slane %v575_v41, 1 }
 0x22f   :  { %v577_v43 = vmax.f32 %v575_v41, %v576_v42 }
 0x231   :  { %v579_v44 = vsub.f32 %v557_v29, %v577_v43 }
 0x233   :  { %v582_v45 = vmul.f32 1.442695, %v579_v44 }
 0x235   :  { %901 = vpow2.f32 %v582_v45 }
 0x237   :  { %v900_v46 = vpop.eup %899 }
 0x238   :  { %v584_v47 = vsel %vm563_vm2, %v900_v46, 0.0 }
 0x239   :  { %v585_v48 = vrot.slane %v584_v47, 4 }
 0x23b   :  { %v586_v49 = vadd.f32 %v585_v48, %v584_v47 }
 0x23d   :  { %v587_v51 = vrot.slane %v586_v49, 2 }
 0x23f   :  { %v902_v52 = vpop.eup %901  ;;  %v588_v53 = vadd.f32 %v587_v51, %v586_v49 }
 0x240   :  { %v591_v54 = vsel %vm563_vm2, %v902_v52, 0.0 }
 0x241   :  { %v589_v55 = vrot.slane %v588_v53, 1  ;;  %v592_v56 = vrot.slane %v591_v54, 4 }
 0x243   :  { %v590_v57 = vadd.f32 %v589_v55, %v588_v53  ;;  %v593_v58 = vadd.f32 %v592_v56, %v591_v54 }
 0x245   :  { %903 = vrcp.f32 %v590_v57  ;;  %v594_v59 = vrot.slane %v593_v58, 2 }
 0x247   :  { %v595_v60 = vadd.f32 %v594_v59, %v593_v58 }
 0x249   :  { %v596_v61 = vrot.slane %v595_v60, 1 }
 0x24b   :  { %v597_v62 = vadd.f32 %v596_v61, %v595_v60 }
 0x24d   :  { %905 = vrcp.f32 %v597_v62 }
 0x24f   :  { %v904_v63 = vpop.eup %903 }
 0x250   :  { %v600_v0 = vmul.f32 %v904_v63, %v900_v46 }
 0x252   :  { %v602_v1 = vpack.c.bf16 %v600_v0, %v600_v0 }
 0x254   :  { %814 = vmatmul.mubr.msk.bf16.vlgmr.msra.gmra.mrb[12].mxu1 %vm563_vm2, %v602_v1 }
 0x255   :  { %818 = vmatpush3.bf16.msra.mxu1 %v655_v19  ;;  %819 = vmatprep.mubr.msk.bf16.mxu1 %vm986_vm0, %v985_v50 }
 0x257   :  { %v906_v2 = vpop.eup %905 }
 0x258   :  { %v601_v3 = vmul.f32 %v906_v2, %v902_v52 }
 0x25a   :  { %v603_v4 = vpack.c.bf16 %v601_v3, %v601_v3 }
 0x25c   :  { %820 = vmatmul.mubr.msk.bf16.vlgmr.msra.gmra.mrb[16].mxu1 %vm563_vm2, %v603_v4 }
 0x327   :  { %v645_v5 = vpop.f32.mrb[12].mxu1 }
 0x328   :  { %697 = vst [vmem:[#allocation7] sm:$0xff] %v645_v5  ;;  %v815_v6 = vpop.f32.mrb[13].mxu1 }
 0x329   :  { %v648_v7 = vpop.f32.mrb[14].mxu1 }
 0x32a   :  { %v816_v8 = vpop.f32.mrb[15].mxu1 }
 0x32f   :  { %v691_v9 = vpop.f32.mrb[16].mxu1 }
 0x330   :  { %698 = vst [vmem:[#allocation7 + $0x8] sm:$0xff] %v691_v9  ;;  %v821_v10 = vpop.f32.mrb[17].mxu1 }
 0x331   :  { %v694_v11 = vpop.f32.mrb[18].mxu1 }
 0x332   :  { %962 = shalt.err (!%p959_p6)
}
 0x333   :  { %s963_s17 = scalar_lea.hbm %s1074_s3, 256 }
 0x334   :  { %p964_p7 = scmp.ne.s32.totalorder %s1074_s3, %s963_s17  ;;  %p967_p8 = scmp.lt.u32.totalorder %s963_s17, %s1074_s3 }
 0x336   :  { %p969_p9 = pnand %p967_p8, %p964_p7 }
 0x338   :  { %972 = shalt.err (!%p969_p9)
}
 0x339   :  { %710 = dma.vmem_to_hbm [thread:$0]  %s705_s13, 256, %s1074_s3, [#allocation4], %s980_s22, %s980_s22, %s981_s23   ;;  %v822_v50 = vpop.f32.mrb[19].mxu1 }
 0x33a   :  { %977 = dma.done.wait [#allocation4], 256  }
 0x33b   :  { %978 = vsyncadd [#allocation4], 4294967040 }
 0x33c   :  { %714 = vsyncpa [#allocation3], 1 }
 0x33d   :  { %715 = vsyncpa [#allocation6], 1 }
 0x33e   :  { %716 = vsyncpa [#allocation4], 1 }

</bundles_post_ra>
